<compile_context>
chip_gen: v7x
topology: tpu7x:2x2x1
jax: 0.10.0
libtpu: 0.0.40
codegen_flags: <defaults>
</compile_context>

<pallas_src>
import functools

import jax
import jax.numpy as jnp
from jax.experimental import pallas as pl
from jax.experimental.pallas import tpu as pltpu

LN_EPS = 1e-5  # PyTorch nn.LayerNorm default


def _round_up(x, m):
    return ((x + m - 1) // m) * m


def _cdiv(a, b):
    return -(-a // b)


def _vmem_capacity_bytes():
    """Physical VMEM per TensorCore for the local device (best effort)."""
    try:
        return int(pltpu.get_tpu_info().vmem_capacity_bytes)
    except Exception:
        pass
    try:
        kind = jax.devices()[0].device_kind.lower()
    except Exception:
        kind = ""
    if "v7" in kind:
        return 64 << 20
    if "v2" in kind or "v3" in kind:
        return 32 << 20
    return 128 << 20  # v4 / v5e / v6e


def _linear_layer_kernel(x_ref, gamma_ref, beta_ref, w_ref, b_ref, o_ref, xn_ref,
                         *, layer_norm: bool, relu: bool):
    # x_ref: (tm, D_in) rows; w_ref: (D_in, tn); b_ref: (1, tn); o_ref: (tm, tn)
    # xn_ref: (tm, D_in) VMEM scratch holding the normalized (and dtype-cast) rows.

    # LayerNorm (or plain cast) hoisted out of the output-feature (j) loop:
    # compute once per row tile at j == 0, reuse the scratch for all j > 0.
    @pl.when(pl.program_id(1) == 0)
    def _():
        if layer_norm:
            xf = x_ref[...].astype(jnp.float32)
            mean = jnp.mean(xf, axis=-1, keepdims=True)
            xc = xf - mean
            var = jnp.mean(xc * xc, axis=-1, keepdims=True)
            xn = xc * jax.lax.rsqrt(var + LN_EPS)
            xn = (xn * gamma_ref[...].astype(jnp.float32)
                  + beta_ref[...].astype(jnp.float32))
            xn_ref[...] = xn.astype(xn_ref.dtype)
        else:
            xn_ref[...] = x_ref[...].astype(xn_ref.dtype)

    # Dropout == identity (eval mode).
    # TODO(synk): training-mode dropout via pltpu.prng_seed / prng_random_bits.

    # Operands arrive in the compute dtype (bf16 by default for f32 inputs);
    # accumulation is f32 on the MXU regardless.
    y = jnp.dot(xn_ref[...], w_ref[...], preferred_element_type=jnp.float32)
    y = y + b_ref[...].astype(jnp.float32)
    if relu:
        y = jnp.maximum(y, 0.0)
    o_ref[...] = y.astype(o_ref.dtype)


@functools.partial(
    jax.jit,
    static_argnames=("layer_norm", "relu", "tile_rows", "tile_n", "matmul_dtype"))
def linear_layer_forward(x, gamma, beta, weight, bias, *,
                         layer_norm=True, relu=True,
                         tile_rows=1024, tile_n=256, matmul_dtype="auto"):
    """x: (N, L, D_in); weight: (D_in, D_out) (transposed vs PyTorch nn.Linear);
    gamma/beta: (D_in,); bias: (D_out,). Returns (N, L, D_out)."""
    N, L, D_in = x.shape
    D_out = weight.shape[1]
    M = N * L

    if matmul_dtype == "auto":
        matmul_dtype = jnp.bfloat16 if x.dtype == jnp.dtype(jnp.float32) else None
    compute_dtype = jnp.dtype(matmul_dtype) if matmul_dtype is not None else jnp.dtype(x.dtype)

    # ---- output-feature (D_out) tiling: lane-dense, multiples of 128 ----
    tn_cap = max(128, _round_up(tile_n, 128))
    if D_out <= tn_cap:
        tn = max(128, _round_up(D_out, 128))   # single lane-dense tile
    else:
        tn = tn_cap
    N_pad = _round_up(D_out, tn)

    # ---- row (M) tiling: multiples of 8; keep >=2 row tiles for megacore (v7x) ----
    tm = min(_round_up(tile_rows, 8), _round_up(M, 8))
    if M > 256 and _cdiv(M, tm) < 2:
        tm = _round_up(_cdiv(M, 2), 8)

    # ---- generation-aware VMEM budget; shrink tm until the tile set fits ----
    x_isz = jnp.dtype(x.dtype).itemsize
    c_isz = compute_dtype.itemsize
    out_isz = x_isz
    budget = (_vmem_capacity_bytes() * 3) // 4   # ~96 MiB v5e/v6e, ~48 MiB v7x

    def _estimate(tm_, tn_):
        est = 2 * tm_ * D_in * x_isz          # x tile (double-buffered)
        est += 2 * D_in * tn_ * c_isz         # weight slab (double-buffered)
        est += 2 * tm_ * tn_ * out_isz        # output tile (double-buffered)
        est += tm_ * D_in * c_isz             # normalized-x VMEM scratch
        est += 2 * tm_ * D_in * 4             # in-kernel f32 LN temporaries
        est += tm_ * tn_ * 4                  # f32 matmul result before cast
        est += 4 * (2 * D_in + 2 * tn_) * 4   # gamma/beta/bias blocks (small)
        return est

    headroom = 8 << 20                        # Mosaic internal scratch slack
    while _estimate(tm, tn) + headroom > budget and tm > 64:
        tm = _round_up(max(64, tm // 2), 8)
    M_pad = _round_up(M, tm)
    vmem_limit = int(min(budget, max(_estimate(tm, tn) + headroom, 32 << 20)))

    # ---- operand prep (pads/slices are skipped when shapes already divide) ----
    x2d = x.reshape(M, D_in)
    if M_pad != M:
        # TODO(synk): mask the trailing row tile in-kernel instead of padding here.
        x2d = jnp.pad(x2d, ((0, M_pad - M), (0, 0)))

    w2d = weight.astype(compute_dtype) if weight.dtype != compute_dtype else weight
    b1d = bias
    if N_pad != D_out:
        w2d = jnp.pad(w2d, ((0, 0), (0, N_pad - D_out)))
        b1d = jnp.pad(b1d, (0, N_pad - D_out))

    gamma2d = gamma.reshape(1, D_in)
    beta2d = beta.reshape(1, D_in)
    bias2d = b1d.reshape(1, N_pad)

    kernel = functools.partial(_linear_layer_kernel,
                               layer_norm=layer_norm, relu=relu)
    grid = (M_pad // tm, N_pad // tn)

    out2d = pl.pallas_call(
        kernel,
        out_shape=jax.ShapeDtypeStruct((M_pad, N_pad), x.dtype),
        grid_spec=pltpu.PrefetchScalarGridSpec(
            num_scalar_prefetch=0,
            grid=grid,
            in_specs=[
                pl.BlockSpec((tm, D_in), lambda i, j: (i, 0)),    # x rows (block idx fixed over j)
                pl.BlockSpec((1, D_in), lambda i, j: (0, 0)),     # gamma
                pl.BlockSpec((1, D_in), lambda i, j: (0, 0)),     # beta
                pl.BlockSpec((D_in, tn), lambda i, j: (0, j)),    # weight slab
                pl.BlockSpec((1, tn), lambda i, j: (0, j)),       # bias
            ],
            out_specs=pl.BlockSpec((tm, tn), lambda i, j: (i, j)),
            scratch_shapes=[pltpu.VMEM((tm, D_in), compute_dtype)],
        ),
        compiler_params=pltpu.CompilerParams(
            dimension_semantics=("parallel", "arbitrary"),
            vmem_limit_bytes=vmem_limit),
    )(x2d, gamma2d, beta2d, w2d, bias2d)

    out = out2d
    if M_pad != M or N_pad != D_out:
        out = out[:M, :D_out]
    return out.reshape(N, L, D_out)


def _reference(x, gamma, beta, weight, bias, *, layer_norm=True, relu=True):
    xf = x.astype(jnp.float32)
    if layer_norm:
        mean = jnp.mean(xf, axis=-1, keepdims=True)
        var = jnp.mean((xf - mean) ** 2, axis=-1, keepdims=True)
        xf = (xf - mean) / jnp.sqrt(var + LN_EPS)
        xf = xf * gamma + beta
    y = xf @ weight.astype(jnp.float32) + bias
    if relu:
        y = jnp.maximum(y, 0.0)
    return y.astype(x.dtype)


if __name__ == "__main__":
    key = jax.random.PRNGKey(0)
    kx, kw, kb, kx2, kw3, kb3 = jax.random.split(key, 6)

    # ---- Case 1: small (N, L, D) shapes, default bf16 MXU path, LN + ReLU ----
    N, L, D_in, D_out = 2, 8, 32, 32
    x = jax.random.normal(kx, (N, L, D_in), dtype=jnp.float32)

    # PyTorch Linear weight is (out, in); we keep the transposed (in, out) layout.
    bound = 1.0 / (D_in ** 0.5)
    weight = jax.random.uniform(kw, (D_in, D_out), minval=-bound, maxval=bound,
                                dtype=jnp.float32)
    bias = jax.random.uniform(kb, (D_out,), minval=-bound, maxval=bound,
                              dtype=jnp.float32)
    gamma = jnp.ones((D_in,), dtype=jnp.float32)   # nn.LayerNorm weight init
    beta = jnp.zeros((D_in,), dtype=jnp.float32)   # nn.LayerNorm bias init

    out = linear_layer_forward(x, gamma, beta, weight, bias,
                               layer_norm=True, relu=True)
    out = jax.block_until_ready(out)
    ref = _reference(x, gamma, beta, weight, bias, layer_norm=True, relu=True)
    assert out.shape == (N, L, D_out)
    assert jnp.allclose(out, ref, atol=2e-2, rtol=2e-2), "mismatch (case 1, bf16 path)"

    # ---- Case 2: ragged row count (M=15), no LN/ReLU, exact f32 MXU path ----
    N2, L2 = 3, 5
    x2 = jax.random.normal(kx2, (N2, L2, D_in), dtype=jnp.float32)
    out2 = linear_layer_forward(x2, gamma, beta, weight, bias,
                                layer_norm=False, relu=False, matmul_dtype=None)
    out2 = jax.block_until_ready(out2)
    ref2 = _reference(x2, gamma, beta, weight, bias, layer_norm=False, relu=False)
    assert out2.shape == (N2, L2, D_out)
    assert jnp.allclose(out2, ref2, atol=1e-4, rtol=1e-4), "mismatch (case 2, f32 path)"

    # ---- Case 3: multiple row tiles AND multiple output-feature tiles:
    # exercises the hoisted-LN scratch reuse across j and lane-padding of D_out.
    D_out3 = 320
    weight3 = jax.random.uniform(kw3, (D_in, D_out3), minval=-bound, maxval=bound,
                                 dtype=jnp.float32)
    bias3 = jax.random.uniform(kb3, (D_out3,), minval=-bound, maxval=bound,
                               dtype=jnp.float32)
    out3 = linear_layer_forward(x, gamma, beta, weight3, bias3,
                                layer_norm=True, relu=True,
                                tile_rows=8, tile_n=128, matmul_dtype=None)
    out3 = jax.block_until_ready(out3)
    ref3 = _reference(x, gamma, beta, weight3, bias3, layer_norm=True, relu=True)
    assert out3.shape == (N, L, D_out3)
    assert jnp.allclose(out3, ref3, atol=1e-4, rtol=1e-4), "mismatch (case 3, tiled path)"

    print("KERNEL_OK")
</pallas_src>

<mosaic_0001>
module attributes {stable_mosaic.version = 11 : i64} {
  func.func @_linear_layer_kernel(%arg0: i32, %arg1: i32, %arg2: memref<16x32xf32, #tpu.memory_space<vmem>>, %arg3: memref<1x32xf32, #tpu.memory_space<vmem>>, %arg4: memref<1x32xf32, #tpu.memory_space<vmem>>, %arg5: memref<32x128xbf16, #tpu.memory_space<vmem>>, %arg6: memref<1x128xf32, #tpu.memory_space<vmem>>, %arg7: memref<16x128xf32, #tpu.memory_space<vmem>>, %arg8: memref<16x32xbf16, #tpu.memory_space<vmem>>) attributes {dimension_semantics = [#tpu.dimension_semantics<parallel>, #tpu.dimension_semantics<arbitrary>], iteration_bounds = array<i64: 1, 1>, scalar_prefetch = 0 : i64, scratch_operands = 1 : i64, tpu.core_type = #tpu.core_type<tc>, window_params = [{transform_indices = @transform_0, window_bounds = array<i64: 16, 32>}, {pipeline_mode = #tpu.pipeline_mode<synchronous>, transform_indices = @transform_1, window_bounds = array<i64: 1, 32>}, {pipeline_mode = #tpu.pipeline_mode<synchronous>, transform_indices = @transform_2, window_bounds = array<i64: 1, 32>}, {transform_indices = @transform_3, window_bounds = array<i64: 32, 128>}, {transform_indices = @transform_4, window_bounds = array<i64: 1, 128>}, {transform_indices = @transform_5, window_bounds = array<i64: 16, 128>}]} {
    %c0_i32 = arith.constant 0 : i32
    %0 = arith.cmpi eq, %arg1, %c0_i32 : i32
    %1 = arith.extui %0 : i1 to i32
    %c0_i32_0 = arith.constant 0 : i32
    %2 = arith.cmpi ne, %1, %c0_i32_0 : i32
    scf.if %2 {
      %c0_9 = arith.constant 0 : index
      %c0_10 = arith.constant 0 : index
      %12 = vector.load %arg2[%c0_9, %c0_10] : memref<16x32xf32, #tpu.memory_space<vmem>>, vector<16x32xf32>
      %cst_11 = arith.constant dense<0.000000e+00> : vector<16xf32>
      %13 = vector.multi_reduction <add>, %12, %cst_11 [1] : vector<16x32xf32> to vector<16xf32>
      %14 = vector.shape_cast %13 : vector<16xf32> to vector<16x1xf32>
      %cst_12 = arith.constant 3.200000e+01 : f32
      %15 = vector.broadcast %cst_12 : f32 to vector<16x1xf32>
      %16 = arith.divf %14, %15 : vector<16x1xf32>
      %17 = vector.broadcast %16 : vector<16x1xf32> to vector<16x32xf32>
      %18 = arith.subf %12, %17 : vector<16x32xf32>
      %19 = arith.mulf %18, %18 : vector<16x32xf32>
      %cst_13 = arith.constant dense<0.000000e+00> : vector<16xf32>
      %20 = vector.multi_reduction <add>, %19, %cst_13 [1] : vector<16x32xf32> to vector<16xf32>
      %21 = vector.shape_cast %20 : vector<16xf32> to vector<16x1xf32>
      %cst_14 = arith.constant 3.200000e+01 : f32
      %22 = vector.broadcast %cst_14 : f32 to vector<16x1xf32>
      %23 = arith.divf %21, %22 : vector<16x1xf32>
      %cst_15 = arith.constant 9.99999974E-6 : f32
      %24 = vector.broadcast %cst_15 : f32 to vector<16x1xf32>
      %25 = arith.addf %23, %24 : vector<16x1xf32>
      %26 = math.rsqrt %25 : vector<16x1xf32>
      %27 = vector.broadcast %26 : vector<16x1xf32> to vector<16x32xf32>
      %28 = arith.mulf %18, %27 : vector<16x32xf32>
      %c0_16 = arith.constant 0 : index
      %c0_17 = arith.constant 0 : index
      %29 = vector.load %arg3[%c0_16, %c0_17] : memref<1x32xf32, #tpu.memory_space<vmem>>, vector<1x32xf32>
      %30 = vector.broadcast %29 : vector<1x32xf32> to vector<16x32xf32>
      %31 = arith.mulf %28, %30 : vector<16x32xf32>
      %c0_18 = arith.constant 0 : index
      %c0_19 = arith.constant 0 : index
      %32 = vector.load %arg4[%c0_18, %c0_19] : memref<1x32xf32, #tpu.memory_space<vmem>>, vector<1x32xf32>
      %33 = vector.broadcast %32 : vector<1x32xf32> to vector<16x32xf32>
      %34 = arith.addf %31, %33 : vector<16x32xf32>
      %35 = arith.truncf %34 : vector<16x32xf32> to vector<16x32xbf16>
      %c0_20 = arith.constant 0 : index
      %c0_21 = arith.constant 0 : index
      %36 = vector.load %arg8[%c0_20, %c0_21] : memref<16x32xbf16, #tpu.memory_space<vmem>>, vector<16x32xbf16>
      tpu.vector_store %arg8[%c0_20, %c0_21], %35 {strides = array<i32>} : memref<16x32xbf16, #tpu.memory_space<vmem>>, vector<16x32xbf16>,
    } else {
    }
    %c0 = arith.constant 0 : index
    %c0_1 = arith.constant 0 : index
    %3 = vector.load %arg8[%c0, %c0_1] : memref<16x32xbf16, #tpu.memory_space<vmem>>, vector<16x32xbf16>
    %c0_2 = arith.constant 0 : index
    %c0_3 = arith.constant 0 : index
    %4 = vector.load %arg5[%c0_2, %c0_3] : memref<32x128xbf16, #tpu.memory_space<vmem>>, vector<32x128xbf16>
    %cst = arith.constant dense<0.000000e+00> : vector<16x128xf32>
    %5 = tpu.matmul %3, %4, %cst {dimension_numbers = #tpu.dot_dimension_numbers<[1], [0], [0], [1], [0, 0, 1, 1], [], []>} : vector<16x32xbf16>, vector<32x128xbf16>, vector<16x128xf32> -> vector<16x128xf32>
    %c0_4 = arith.constant 0 : index
    %c0_5 = arith.constant 0 : index
    %6 = vector.load %arg6[%c0_4, %c0_5] : memref<1x128xf32, #tpu.memory_space<vmem>>, vector<1x128xf32>
    %7 = vector.broadcast %6 : vector<1x128xf32> to vector<16x128xf32>
    %8 = arith.addf %5, %7 : vector<16x128xf32>
    %cst_6 = arith.constant 0.000000e+00 : f32
    %9 = vector.broadcast %cst_6 : f32 to vector<16x128xf32>
    %10 = arith.maximumf %8, %9 : vector<16x128xf32>
    %c0_7 = arith.constant 0 : index
    %c0_8 = arith.constant 0 : index
    %11 = vector.load %arg7[%c0_7, %c0_8] : memref<16x128xf32, #tpu.memory_space<vmem>>, vector<16x128xf32>
    tpu.vector_store %arg7[%c0_7, %c0_8], %10 {strides = array<i32>} : memref<16x128xf32, #tpu.memory_space<vmem>>, vector<16x128xf32>,
    return
  }
  func.func @transform_0(%arg0: i32, %arg1: i32) -> (i32, i32) {
    %c0_i32 = arith.constant 0 : i32
    %c0_i32_0 = arith.constant 0 : i32
    return %arg0, %c0_i32 : i32, i32
  }
  func.func @transform_1(%arg0: i32, %arg1: i32) -> (i32, i32) {
    %c0_i32 = arith.constant 0 : i32
    %c0_i32_0 = arith.constant 0 : i32
    %c0_i32_1 = arith.constant 0 : i32
    return %c0_i32, %c0_i32_0 : i32, i32
  }
  func.func @transform_2(%arg0: i32, %arg1: i32) -> (i32, i32) {
    %c0_i32 = arith.constant 0 : i32
    %c0_i32_0 = arith.constant 0 : i32
    %c0_i32_1 = arith.constant 0 : i32
    return %c0_i32, %c0_i32_0 : i32, i32
  }
  func.func @transform_3(%arg0: i32, %arg1: i32) -> (i32, i32) {
    %c0_i32 = arith.constant 0 : i32
    %c0_i32_0 = arith.constant 0 : i32
    return %c0_i32, %arg1 : i32, i32
  }
  func.func @transform_4(%arg0: i32, %arg1: i32) -> (i32, i32) {
    %c0_i32 = arith.constant 0 : i32
    %c0_i32_0 = arith.constant 0 : i32
    return %c0_i32, %arg1 : i32, i32
  }
  func.func @transform_5(%arg0: i32, %arg1: i32) -> (i32, i32) {
    %c0_i32 = arith.constant 0 : i32
    return %arg0, %arg1 : i32, i32
  }
}

</mosaic_0001>

<bundles_post_ra>
// kernel: linear_layer_forward.1
= control target key start
LH: loop header
LB: loop body
LE: loop exit
PB: predicated region body
PF: predicated region fallthrough
CT: control target
= control target key end

     0   :  { %vm27_vm0 = vcmask 261120   ;;  %v177_v15 = vmov 0.0   ;;  %vm178_vm1 = vmmov 0   ;;  %s242_s0 = inlined_call_operand.vmem [shape: f32[16,32], index: 0, kind: input, shape index: {}]   ;;  %s243_s3 = inlined_call_operand.vmem [shape: bf16[32,128], index: 3, kind: input, shape index: {}]   ;;  %s244_s1 = inlined_call_operand.vmem [shape: f32[1,32], index: 1, kind: input, shape index: {}]   ;;  %s245_s2 = inlined_call_operand.vmem [shape: f32[1,32], index: 2, kind: input, shape index: {}]   ;;  %s246_s4 = inlined_call_operand.vmem [shape: f32[1,128], index: 4, kind: input, shape index: {}]   ;;  %s247_s5 = inlined_call_operand.vmem [shape: f32[16,128], index: 5, kind: output, shape index: {}]  }
   0x1   :  { %v25_v0 = vld [vmem:[%s242_s0] sm:$0xff]  ;;  %v26_v1 = vld [vmem:[%s242_s0 + $0x8] sm:$0xff]  ;;  %161 = vmatprep.subr.bf16.mxu0 %v177_v15  ;;  %165 = vmatprep.mubr.msk.bf16.mxu0 %vm178_vm1, %v177_v15 }
   0x2   :  { %v28_v2 = vsel %vm27_vm0, %v25_v0, 0.0  ;;  %v31_v3 = vsel %vm27_vm0, %v26_v1, 0.0  ;;  %v171_v14 = vld [vmem:[%s243_s3] sm:$0xff]   ;;  %v172_v16 = vld [vmem:[%s243_s3 + $0x8] sm:$0xff]  }
   0x3   :  { %29 = vadd.xlane.f32.xlu0 %v28_v2  ;;  %162 = vmatpush3.bf16.msra.mxu0 %v171_v14  ;;  %v152_v25 = vld [vmem:[%s244_s1] ss:$0 sm:$0xff] }
   0x4   :  { %163 = vmatprep.subr.bf16.mxu0 %v177_v15  ;;  %v153_v29 = vld [vmem:[%s245_s2] ss:$0 sm:$0xff] }
   0x5   :  { %v154_v35 = vld [vmem:[%s246_s4] ss:$0 sm:$0xff] }
   0x7   :  { %32 = vadd.xlane.f32.xlu0 %v31_v3  ;;  %164 = vmatpush3.bf16.msra.mxu0 %v172_v16 }
  0x90   :  { %v30_v4 = vpop.xlane.xlu0 %29 }
  0x91   :  { %v35_v5 = vmul.f32 0.03125, %v30_v4 }
  0x93   :  { %v37_v6 = vsub.f32 %v25_v0, %v35_v5 }
  0x94   :  { %v33_v7 = vpop.xlane.xlu0 %32 }
  0x95   :  { %v36_v8 = vmul.f32 0.03125, %v33_v7  ;;  %v39_v9 = vmul.f32 %v37_v6, %v37_v6 }
  0x97   :  { %v38_v10 = vsub.f32 %v26_v1, %v36_v8  ;;  %v41_v11 = vsel %vm27_vm0, %v39_v9, 0.0 }
  0x98   :  { %42 = vadd.xlane.f32.xlu1 %v41_v11 }
  0x99   :  { %v40_v12 = vmul.f32 %v38_v10, %v38_v10 }
  0x9b   :  { %v44_v13 = vsel %vm27_vm0, %v40_v12, 0.0 }
  0x9c   :  { %45 = vadd.xlane.f32.xlu1 %v44_v13 }
 0x125   :  { %v43_v17 = vpop.xlane.xlu1 %42 }
 0x126   :  { %v47_v18 = vmul.f32 0.03125, %v43_v17 }
 0x128   :  { %v49_v19 = vadd.f32 1e-05, %v47_v18 }
 0x129   :  { %v46_v20 = vpop.xlane.xlu1 %45 }
 0x12a   :  { %173 = vrsqrt.f32 %v49_v19  ;;  %v48_v21 = vmul.f32 0.03125, %v46_v20 }
 0x12c   :  { %v50_v22 = vadd.f32 1e-05, %v48_v21 }
 0x12e   :  { %175 = vrsqrt.f32 %v50_v22 }
 0x134   :  { %v174_v23 = vpop.eup %173 }
 0x135   :  { %v53_v24 = vmul.f32 %v174_v23, %v37_v6 }
 0x137   :  { %v62_v27 = vmul.f32 %v152_v25, %v53_v24 }
 0x138   :  { %v176_v26 = vpop.eup %175 }
 0x139   :  { %v54_v28 = vmul.f32 %v176_v26, %v38_v10  ;;  %v71_v31 = vadd.f32 %v153_v29, %v62_v27 }
 0x13b   :  { %v63_v30 = vmul.f32 %v152_v25, %v54_v28 }
 0x13d   :  { %v72_v32 = vadd.f32 %v153_v29, %v63_v30 }
 0x13f   :  { %v73_v33 = vpack.c.bf16 %v72_v32, %v71_v31 }
 0x141   :  { %74 = vst.msk [vmem:[#allocation2] sm:$0xff] %vm27_vm0, %v73_v33 }
 0x148   :  { %v75_v34 = vld [vmem:[#allocation2] sm:$0xff] }
 0x149   :  { %166 = vmatmul.mubr.msk.bf16.vlgmr.msra.gmra.mrb[0].mxu0 %vm27_vm0, %v75_v34 }
 0x21c   :  { %v137_v36 = vpop.f32.mrb[0].mxu0 }
 0x21d   :  { %v138_v37 = vadd.f32 %v154_v35, %v137_v36  ;;  %v167_v38 = vpop.f32.mrb[1].mxu0 }
 0x21e   :  { %v140_v39 = vpop.f32.mrb[2].mxu0 }
 0x21f   :  { %v144_v40 = vmax.f32 %v138_v37, 0.0  ;;  %v141_v41 = vadd.f32 %v154_v35, %v140_v39  ;;  %v168_v42 = vpop.f32.mrb[3].mxu0 }
 0x221   :  { %146 = vst [vmem:[%s247_s5] sm:$0xff] %v144_v40  ;;  %v145_v43 = vmax.f32 %v141_v41, 0.0 }
 0x223   :  { %147 = vst [vmem:[%s247_s5 + $0x8] sm:$0xff] %v145_v43 }

</bundles_post_ra>
